<compile_context>
chip_gen: v7x
topology: tpu7x:2x2x1
jax: 0.10.0
libtpu: 0.0.40
codegen_flags: <defaults>
</compile_context>

<pallas_src>
import functools

import jax
import jax.numpy as jnp
from jax.experimental import pallas as pl
from jax.experimental.pallas import tpu as pltpu

_MIB = 1024 * 1024


def _round_up(x, m):
    return ((x + m - 1) // m) * m


def _device_kind():
    try:
        return jax.devices()[0].device_kind.lower()
    except Exception:
        return ""


def _vmem_capacity_bytes():
    """Physical VMEM per TensorCore; conservative 64 MiB (v7x) fallback."""
    try:
        cap = int(pltpu.get_tpu_info().vmem_capacity_bytes)
        if cap > 0:
            return cap
    except Exception:
        pass
    return 64 * _MIB


def _mxu_lane_multiple():
    """256-wide MXU on v6e/v7x; 128 on v5e and older generations."""
    kind = _device_kind()
    if any(g in kind for g in ("v2", "v3", "v4", "v5")):
        return 128
    return 256


def _lane_round(d, big_mult):
    # Minimum lane alignment is 128; only pad to the full MXU width when the
    # real dim already exceeds 128 (small dims are DMA-bound, not MXU-bound).
    return 128 if d <= 128 else _round_up(d, big_mult)


def prepack_linear_params(w1, b1, w2, b2):
    """Run ONCE at init (hoisted out of the per-call path).

    nn.Linear weights arrive as [out, in]; we transpose to [in, out] (native MXU
    layout, no in-kernel transpose), zero-pad every feature dim lane-dense, and
    cast weights directly to bf16 (no f32 padded intermediate).  Biases stay f32.
    """
    hidden, d_in = w1.shape
    num_classes = w2.shape[0]
    big = _mxu_lane_multiple()
    d_in_p = _lane_round(d_in, big)
    hid_p = _lane_round(hidden, big)
    cls_p = _lane_round(num_classes, big)

    w1_t = jnp.pad(w1.T.astype(jnp.bfloat16),
                   ((0, d_in_p - d_in), (0, hid_p - hidden)))
    w2_t = jnp.pad(w2.T.astype(jnp.bfloat16),
                   ((0, hid_p - hidden), (0, cls_p - num_classes)))
    b1_p = jnp.pad(b1.astype(jnp.float32), (0, hid_p - hidden)).reshape(1, hid_p)
    b2_p = jnp.pad(b2.astype(jnp.float32), (0, cls_p - num_classes)).reshape(1, cls_p)
    return w1_t, b1_p, w2_t, b2_p


def _mlp_kernel(x_ref, w1_ref, b1_ref, w2_ref, b2_ref, o_ref):
    # fc1: [tb, Din_p](bf16) @ [Din_p, H_p](bf16) -> f32 accumulation on the MXU.
    h = jnp.dot(x_ref[...], w1_ref[...], preferred_element_type=jnp.float32)
    h = h + b1_ref[...]                                   # f32 bias add (VPU)
    # fc2: re-cast activations to bf16 for the MXU, accumulate in f32.
    y = jnp.dot(h.astype(w2_ref.dtype), w2_ref[...],
                preferred_element_type=jnp.float32)
    o_ref[...] = (y + b2_ref[...]).astype(o_ref.dtype)


def _choose_batch_blocking(batch, per_row_bytes, avail_bytes):
    """Pick (tb, b_p, n_blocks): 16-row aligned (bf16 packing), VMEM-capped,
    minimal zero-row padding, and >= 2 blocks when the batch allows (so the
    'parallel' grid axis can shard across both v7x TensorCores)."""
    b16 = _round_up(batch, 16)
    max_tb = max(16, min(1024, (avail_bytes // max(per_row_bytes, 1)) // 16 * 16))
    n_blocks = max(-(-b16 // max_tb), 2 if b16 >= 32 else 1)
    tb = _round_up(-(-b16 // n_blocks), 16)
    return tb, n_blocks * tb, n_blocks


def linear_forward(text, text_lengths, w1_t, b1_p, w2_t, b2_p, *, num_classes):
    """Mirrors Linear.forward(text, text_lengths).  Weights arrive prepacked
    (prepack_linear_params), so there is no per-call transpose/pad/cast traffic."""
    del text_lengths  # unused by the reference forward pass

    batch, d_in = text.shape
    d_in_p, hid_p = w1_t.shape
    cls_p = w2_t.shape[1]

    vmem_cap = _vmem_capacity_bytes()
    vmem_budget = min(100 * _MIB, max(vmem_cap - 16 * _MIB, 32 * _MIB))

    # Fully resident, single-buffered weights + biases.
    weight_bytes = (d_in_p * hid_p + hid_p * cls_p) * 2 + (hid_p + cls_p) * 4
    # Double-buffered x (bf16) + out (f32) bytes per padded batch row.
    per_row_bytes = 2 * d_in_p * 2 + 2 * cls_p * 4
    avail = vmem_budget - weight_bytes - 4 * _MIB
    if avail < per_row_bytes * 16:
        # TODO(synk): add a hidden-dim reduction tile (pltpu.emit_pipeline over H
        # chunks with a (tb, cls_p) f32 VMEM accumulator) for weights > VMEM.
        raise NotImplementedError(
            "prepacked weights exceed the VMEM budget; hidden-dim tiling not implemented")

    tb, b_p, n_blocks = _choose_batch_blocking(batch, per_row_bytes, avail)

    # Pad x directly in bf16 (no f32 padded intermediate).
    x_p = jnp.pad(text.astype(jnp.bfloat16),
                  ((0, b_p - batch), (0, d_in_p - d_in)))

    vmem = pltpu.MemorySpace.VMEM
    const = pl.Buffered(1)  # same block every grid step -> single buffer

    flops = 2 * b_p * (d_in_p * hid_p + hid_p * cls_p)
    bytes_accessed = (x_p.size * 2 + w1_t.size * 2 + w2_t.size * 2
                      + b1_p.size * 4 + b2_p.size * 4 + b_p * cls_p * 4)

    out_p = pl.pallas_call(
        _mlp_kernel,
        out_shape=jax.ShapeDtypeStruct((b_p, cls_p), jnp.float32),
        grid=(n_blocks,),
        in_specs=[
            pl.BlockSpec((tb, d_in_p), lambda i: (i, 0), memory_space=vmem),
            pl.BlockSpec((d_in_p, hid_p), lambda i: (0, 0), memory_space=vmem,
                         pipeline_mode=const),
            pl.BlockSpec((1, hid_p), lambda i: (0, 0), memory_space=vmem,
                         pipeline_mode=const),
            pl.BlockSpec((hid_p, cls_p), lambda i: (0, 0), memory_space=vmem,
                         pipeline_mode=const),
            pl.BlockSpec((1, cls_p), lambda i: (0, 0), memory_space=vmem,
                         pipeline_mode=const),
        ],
        out_specs=pl.BlockSpec((tb, cls_p), lambda i: (i, 0), memory_space=vmem),
        compiler_params=pltpu.CompilerParams(
            dimension_semantics=("parallel",),
            vmem_limit_bytes=int(vmem_budget)),
        cost_estimate=pl.CostEstimate(
            flops=flops, transcendentals=0, bytes_accessed=bytes_accessed),
    )(x_p, w1_t, b1_p, w2_t, b2_p)

    # Drop zero-padded rows / columns.  (Output kept f32 to match the module's
    # semantics; switch o_ref / out_shape to bf16 if downstream tolerates it.)
    return out_p[:batch, :num_classes]


if __name__ == "__main__":
    # Small shapes consistent with the module: input_size=32, hidden=64, num_classes=16.
    batch, input_size, hidden_size, num_classes = 8, 32, 64, 16

    key = jax.random.PRNGKey(0)
    kx, kw1, kb1, kw2, kb2 = jax.random.split(key, 5)

    # PyTorch nn.Linear parameter shapes: W=[out, in], b=[out].
    w1 = jax.random.normal(kw1, (hidden_size, input_size), jnp.float32) * 0.1
    b1 = jax.random.normal(kb1, (hidden_size,), jnp.float32) * 0.1
    w2 = jax.random.normal(kw2, (num_classes, hidden_size), jnp.float32) * 0.1
    b2 = jax.random.normal(kb2, (num_classes,), jnp.float32) * 0.1

    text = jax.random.normal(kx, (batch, input_size), jnp.float32)
    text_lengths = jnp.full((batch,), input_size, dtype=jnp.int32)  # unused by forward

    # One-time weight prepack (hoisted out of the per-call path).
    packed = jax.block_until_ready(prepack_linear_params(w1, b1, w2, b2))

    fwd = jax.jit(functools.partial(linear_forward, num_classes=num_classes))
    preds = jax.block_until_ready(fwd(text, text_lengths, *packed))
    assert preds.shape == (batch, num_classes)

    # Reference 1: same bf16-operand / f32-accumulate math as the kernel (tight check).
    h_ref = jnp.dot(text.astype(jnp.bfloat16), w1.T.astype(jnp.bfloat16),
                    preferred_element_type=jnp.float32) + b1
    ref_bf16 = jnp.dot(h_ref.astype(jnp.bfloat16), w2.T.astype(jnp.bfloat16),
                       preferred_element_type=jnp.float32) + b2
    assert jnp.allclose(preds, ref_bf16, atol=1e-2, rtol=1e-2)

    # Reference 2: pure-f32 math of the original PyTorch module (looser tolerance
    # to account for bf16 matmul operands).
    ref_f32 = (text @ w1.T + b1) @ w2.T + b2
    assert jnp.allclose(preds, ref_f32, atol=5e-2, rtol=5e-2)

    print("KERNEL_OK")
</pallas_src>

<mosaic_0001>
module attributes {stable_mosaic.version = 11 : i64} {
  func.func @_mlp_kernel(%arg0: i32, %arg1: memref<16x128xbf16, #tpu.memory_space<vmem>>, %arg2: memref<128x128xbf16, #tpu.memory_space<vmem>>, %arg3: memref<1x128xf32, #tpu.memory_space<vmem>>, %arg4: memref<128x128xbf16, #tpu.memory_space<vmem>>, %arg5: memref<1x128xf32, #tpu.memory_space<vmem>>, %arg6: memref<16x128xf32, #tpu.memory_space<vmem>>) attributes {dimension_semantics = [#tpu.dimension_semantics<parallel>], iteration_bounds = array<i64: 1>, scalar_prefetch = 0 : i64, scratch_operands = 0 : i64, tpu.core_type = #tpu.core_type<tc>, window_params = [{transform_indices = @transform_0, window_bounds = array<i64: 16, 128>}, {pipeline_mode = #tpu.pipeline_mode<synchronous>, transform_indices = @transform_1, window_bounds = array<i64: 128, 128>}, {pipeline_mode = #tpu.pipeline_mode<synchronous>, transform_indices = @transform_2, window_bounds = array<i64: 1, 128>}, {pipeline_mode = #tpu.pipeline_mode<synchronous>, transform_indices = @transform_3, window_bounds = array<i64: 128, 128>}, {pipeline_mode = #tpu.pipeline_mode<synchronous>, transform_indices = @transform_4, window_bounds = array<i64: 1, 128>}, {transform_indices = @transform_5, window_bounds = array<i64: 16, 128>}]} {
    %c0 = arith.constant 0 : index
    %c0_0 = arith.constant 0 : index
    %0 = vector.load %arg1[%c0, %c0_0] : memref<16x128xbf16, #tpu.memory_space<vmem>>, vector<16x128xbf16>
    %c0_1 = arith.constant 0 : index
    %c0_2 = arith.constant 0 : index
    %1 = vector.load %arg2[%c0_1, %c0_2] : memref<128x128xbf16, #tpu.memory_space<vmem>>, vector<128x128xbf16>
    %cst = arith.constant dense<0.000000e+00> : vector<16x128xf32>
    %2 = tpu.matmul %0, %1, %cst {dimension_numbers = #tpu.dot_dimension_numbers<[1], [0], [0], [1], [0, 0, 1, 1], [], []>} : vector<16x128xbf16>, vector<128x128xbf16>, vector<16x128xf32> -> vector<16x128xf32>
    %c0_3 = arith.constant 0 : index
    %c0_4 = arith.constant 0 : index
    %3 = vector.load %arg3[%c0_3, %c0_4] : memref<1x128xf32, #tpu.memory_space<vmem>>, vector<1x128xf32>
    %4 = vector.broadcast %3 : vector<1x128xf32> to vector<16x128xf32>
    %5 = arith.addf %2, %4 : vector<16x128xf32>
    %6 = arith.truncf %5 : vector<16x128xf32> to vector<16x128xbf16>
    %c0_5 = arith.constant 0 : index
    %c0_6 = arith.constant 0 : index
    %7 = vector.load %arg4[%c0_5, %c0_6] : memref<128x128xbf16, #tpu.memory_space<vmem>>, vector<128x128xbf16>
    %cst_7 = arith.constant dense<0.000000e+00> : vector<16x128xf32>
    %8 = tpu.matmul %6, %7, %cst_7 {dimension_numbers = #tpu.dot_dimension_numbers<[1], [0], [0], [1], [0, 0, 1, 1], [], []>} : vector<16x128xbf16>, vector<128x128xbf16>, vector<16x128xf32> -> vector<16x128xf32>
    %c0_8 = arith.constant 0 : index
    %c0_9 = arith.constant 0 : index
    %9 = vector.load %arg5[%c0_8, %c0_9] : memref<1x128xf32, #tpu.memory_space<vmem>>, vector<1x128xf32>
    %10 = vector.broadcast %9 : vector<1x128xf32> to vector<16x128xf32>
    %11 = arith.addf %8, %10 : vector<16x128xf32>
    %c0_10 = arith.constant 0 : index
    %c0_11 = arith.constant 0 : index
    %12 = vector.load %arg6[%c0_10, %c0_11] : memref<16x128xf32, #tpu.memory_space<vmem>>, vector<16x128xf32>
    tpu.vector_store %arg6[%c0_10, %c0_11], %11 {strides = array<i32>} : memref<16x128xf32, #tpu.memory_space<vmem>>, vector<16x128xf32>,
    return
  }
  func.func @transform_0(%arg0: i32) -> (i32, i32) {
    %c0_i32 = arith.constant 0 : i32
    %c0_i32_0 = arith.constant 0 : i32
    return %arg0, %c0_i32 : i32, i32
  }
  func.func @transform_1(%arg0: i32) -> (i32, i32) {
    %c0_i32 = arith.constant 0 : i32
    %c0_i32_0 = arith.constant 0 : i32
    %c0_i32_1 = arith.constant 0 : i32
    return %c0_i32, %c0_i32_0 : i32, i32
  }
  func.func @transform_2(%arg0: i32) -> (i32, i32) {
    %c0_i32 = arith.constant 0 : i32
    %c0_i32_0 = arith.constant 0 : i32
    %c0_i32_1 = arith.constant 0 : i32
    return %c0_i32, %c0_i32_0 : i32, i32
  }
  func.func @transform_3(%arg0: i32) -> (i32, i32) {
    %c0_i32 = arith.constant 0 : i32
    %c0_i32_0 = arith.constant 0 : i32
    %c0_i32_1 = arith.constant 0 : i32
    return %c0_i32, %c0_i32_0 : i32, i32
  }
  func.func @transform_4(%arg0: i32) -> (i32, i32) {
    %c0_i32 = arith.constant 0 : i32
    %c0_i32_0 = arith.constant 0 : i32
    %c0_i32_1 = arith.constant 0 : i32
    return %c0_i32, %c0_i32_0 : i32, i32
  }
  func.func @transform_5(%arg0: i32) -> (i32, i32) {
    %c0_i32 = arith.constant 0 : i32
    %c0_i32_0 = arith.constant 0 : i32
    return %arg0, %c0_i32 : i32, i32
  }
}

</mosaic_0001>

<bundles_post_ra>
// kernel: linear_forward.1
= control target key start
LH: loop header
LB: loop body
LE: loop exit
PB: predicated region body
PF: predicated region fallthrough
CT: control target
= control target key end

     0   :  { %10 = vsyncpa [#allocation3], 0  ;;  %s513_s0 = inlined_call_operand.vmem [shape: bf16[16,128], index: 0, kind: input, shape index: {}]   ;;  %s514_s1 = inlined_call_operand.hbm [shape: bf16[128,128], index: 1, kind: input, shape index: {}]   ;;  %s515_s2 = inlined_call_operand.vmem [shape: f32[1,128], index: 2, kind: input, shape index: {}]   ;;  %s516_s3 = inlined_call_operand.hbm [shape: bf16[128,128], index: 3, kind: input, shape index: {}]   ;;  %s517_s4 = inlined_call_operand.vmem [shape: f32[1,128], index: 4, kind: input, shape index: {}]   ;;  %s518_s5 = inlined_call_operand.vmem [shape: f32[16,128], index: 5, kind: output, shape index: {}]  }
   0x1   :  { %11 = vsyncpa [#allocation5], 0  ;;  %s438_s18 = smov [#allocation2]   ;;  %s390_s22 = scalar_lea.hbm %s514_s1, 1024 }
   0x2   :  { %s19_s19 = sshll.u32 %s438_s18, 4  ;;  %p391_p0 = scmp.ne.s32.totalorder %s514_s1, %s390_s22  ;;  %s20_s19 = int_to_ptr.vmem [resolvable:$true] %s19_s19 }
   0x3   :  { %p394_p1 = scmp.lt.u32.totalorder %s390_s22, %s514_s1 }
   0x5   :  { %p396_p2 = pnand %p394_p1, %p391_p0 }
   0x7   :  { %399 = shalt.err (!%p396_p2)
}
   0x8   :  { %s400_s27 = scalar_lea.vmem %s20_s19, 1024  ;;  %p405_p4 = scmp.lt.s32.totalorder %s20_s19, %s20_s19 }
   0x9   :  { %p401_p3 = scmp.ne.s32.totalorder %s20_s19, %s400_s27  ;;  %p406_p5 = scmp.lt.s32.totalorder %s400_s27, %s400_s27 }
   0xb   :  { %p407_p6 = por %p406_p5, %p405_p4 }
   0xd   :  { %p408_p7 = pnand %p407_p6, %p401_p3 }
   0xf   :  { %411 = shalt.err (!%p408_p7)
}
  0x10   :  { %s439_s28 = smov 64   ;;  %s440_s29 = smov 4  }
  0x11   :  { %25 = dma.hbm_to_vmem [thread:$0]  %s514_s1, 1024, %s20_s19, [#allocation3], %s439_s28, %s439_s28, %s440_s29  }
  0x12   :  { %s441_s7 = smov [#allocation4]   ;;  %s412_s11 = scalar_lea.hbm %s516_s3, 1024 }
  0x13   :  { %s33_s8 = sshll.u32 %s441_s7, 4  ;;  %p413_p8 = scmp.ne.s32.totalorder %s516_s3, %s412_s11  ;;  %s34_s8 = int_to_ptr.vmem [resolvable:$true] %s33_s8 }
  0x14   :  { %p416_p9 = scmp.lt.u32.totalorder %s412_s11, %s516_s3 }
  0x16   :  { %p418_p10 = pnand %p416_p9, %p413_p8 }
  0x18   :  { %421 = shalt.err (!%p418_p10)
}
  0x19   :  { %s422_s16 = scalar_lea.vmem %s34_s8, 1024  ;;  %p427_p12 = scmp.lt.s32.totalorder %s34_s8, %s34_s8 }
  0x1a   :  { %p423_p11 = scmp.ne.s32.totalorder %s34_s8, %s422_s16  ;;  %p428_p13 = scmp.lt.s32.totalorder %s422_s16, %s422_s16 }
  0x1c   :  { %p429_p0 = por %p428_p13, %p427_p12 }
  0x1e   :  { %p430_p1 = pnand %p429_p0, %p423_p11 }
  0x20   :  { %433 = shalt.err (!%p430_p1)
}
  0x21   :  { %39 = dma.hbm_to_vmem [thread:$0]  %s516_s3, 1024, %s34_s8, [#allocation5], %s439_s28, %s439_s28, %s440_s29  }
  0x22   :  { %434 = dma.done.wait [#allocation3], 1024  }
  0x23   :  { %435 = vsyncadd [#allocation3], 4294966272 }
  0x24   :  { %436 = dma.done.wait [#allocation5], 1024  }
  0x25   :  { %437 = vsyncadd [#allocation5], 4294966272  ;;  %v442_v0 = vmov 0.0   ;;  %vm443_vm0 = vmmov 0   ;;  %v373_v1 = vld [vmem:[#allocation2] sm:$0xff]   ;;  %v374_v2 = vld [vmem:[#allocation2 + $0x8] sm:$0xff]  }
  0x26   :  { %327 = vmatprep.subr.bf16.mxu0 %v442_v0  ;;  %343 = vmatprep.mubr.msk.bf16.mxu0 %vm443_vm0, %v442_v0  ;;  %v375_v3 = vld [vmem:[#allocation2 + $0x10] sm:$0xff]   ;;  %v382_v4 = vld [vmem:[#allocation4] sm:$0xff]   ;;  %v376_v5 = vld [vmem:[#allocation2 + $0x18] sm:$0xff]  }
  0x27   :  { %347 = vmatprep.subr.bf16.mxu1 %v442_v0  ;;  %363 = vmatprep.mubr.msk.bf16.mxu1 %vm443_vm0, %v442_v0  ;;  %v383_v6 = vld [vmem:[#allocation4 + $0x8] sm:$0xff]   ;;  %v377_v7 = vld [vmem:[#allocation2 + $0x20] sm:$0xff]   ;;  %v384_v8 = vld [vmem:[#allocation4 + $0x10] sm:$0xff]  }
  0x28   :  { %328 = vmatpush3.bf16.msra.mxu0 %v373_v1  ;;  %348 = vmatpush3.bf16.msra.mxu1 %v382_v4  ;;  %v378_v9 = vld [vmem:[#allocation2 + $0x28] sm:$0xff]   ;;  %v385_v10 = vld [vmem:[#allocation4 + $0x18] sm:$0xff]   ;;  %v379_v11 = vld [vmem:[#allocation2 + $0x30] sm:$0xff]  }
  0x29   :  { %329 = vmatprep.subr.bf16.mxu0 %v442_v0  ;;  %349 = vmatprep.subr.bf16.mxu1 %v442_v0  ;;  %v386_v12 = vld [vmem:[#allocation4 + $0x20] sm:$0xff]   ;;  %v380_v13 = vld [vmem:[#allocation2 + $0x38] sm:$0xff]   ;;  %v387_v14 = vld [vmem:[#allocation4 + $0x28] sm:$0xff]  }
  0x2a   :  { %v381_v15 = vld [vmem:[%s513_s0] sm:$0xff]   ;;  %v388_v16 = vld [vmem:[#allocation4 + $0x30] sm:$0xff]   ;;  %v389_v17 = vld [vmem:[#allocation4 + $0x38] sm:$0xff]  }
  0x2b   :  { %v290_v18 = vld [vmem:[%s515_s2] ss:$0 sm:$0xff] }
  0x2c   :  { %330 = vmatpush3.bf16.msra.mxu0 %v374_v2  ;;  %350 = vmatpush3.bf16.msra.mxu1 %v383_v6  ;;  %v300_v26 = vld [vmem:[%s517_s4] ss:$0 sm:$0xff] }
  0x2d   :  { %331 = vmatprep.subr.bf16.mxu0 %v442_v0  ;;  %351 = vmatprep.subr.bf16.mxu1 %v442_v0 }
  0x30   :  { %332 = vmatpush3.bf16.msra.mxu0 %v375_v3  ;;  %352 = vmatpush3.bf16.msra.mxu1 %v384_v8 }
  0x31   :  { %333 = vmatprep.subr.bf16.mxu0 %v442_v0  ;;  %353 = vmatprep.subr.bf16.mxu1 %v442_v0 }
  0x34   :  { %334 = vmatpush3.bf16.msra.mxu0 %v376_v5  ;;  %354 = vmatpush3.bf16.msra.mxu1 %v385_v10 }
  0x35   :  { %335 = vmatprep.subr.bf16.mxu0 %v442_v0  ;;  %355 = vmatprep.subr.bf16.mxu1 %v442_v0 }
  0x38   :  { %336 = vmatpush3.bf16.msra.mxu0 %v377_v7  ;;  %356 = vmatpush3.bf16.msra.mxu1 %v386_v12 }
  0x39   :  { %337 = vmatprep.subr.bf16.mxu0 %v442_v0  ;;  %357 = vmatprep.subr.bf16.mxu1 %v442_v0 }
  0x3c   :  { %338 = vmatpush3.bf16.msra.mxu0 %v378_v9  ;;  %358 = vmatpush3.bf16.msra.mxu1 %v387_v14 }
  0x3d   :  { %339 = vmatprep.subr.bf16.mxu0 %v442_v0  ;;  %359 = vmatprep.subr.bf16.mxu1 %v442_v0 }
  0x40   :  { %340 = vmatpush3.bf16.msra.mxu0 %v379_v11  ;;  %360 = vmatpush3.bf16.msra.mxu1 %v388_v16 }
  0x41   :  { %341 = vmatprep.subr.bf16.mxu0 %v442_v0  ;;  %361 = vmatprep.subr.bf16.mxu1 %v442_v0 }
  0x44   :  { %342 = vmatpush3.bf16.msra.mxu0 %v380_v13  ;;  %362 = vmatpush3.bf16.msra.mxu1 %v389_v17 }
  0x47   :  { %344 = vmatmul.mubr.bf16.vlgmr.msra.gmra.mrb[0].mxu0 %v381_v15 }
 0x11a   :  { %v162_v19 = vpop.f32.mrb[0].mxu0 }
 0x11b   :  { %v345_v20 = vpop.f32.mrb[1].mxu0  ;;  %v163_v22 = vadd.f32 %v290_v18, %v162_v19 }
 0x11c   :  { %v165_v21 = vpop.f32.mrb[2].mxu0 }
 0x11d   :  { %v166_v23 = vadd.f32 %v290_v18, %v165_v21  ;;  %v346_v24 = vpop.f32.mrb[3].mxu0 }
 0x11f   :  { %v169_v25 = vpack.c.bf16 %v166_v23, %v163_v22 }
 0x121   :  { %364 = vmatmul.mubr.bf16.vlgmr.msra.gmra.mrb[0].mxu1 %v169_v25 }
 0x1f4   :  { %v275_v27 = vpop.f32.mrb[0].mxu1 }
 0x1f5   :  { %v276_v28 = vadd.f32 %v300_v26, %v275_v27  ;;  %v365_v29 = vpop.f32.mrb[1].mxu1 }
 0x1f6   :  { %v278_v30 = vpop.f32.mrb[2].mxu1 }
 0x1f7   :  { %282 = vst [vmem:[%s518_s5] sm:$0xff] %v276_v28  ;;  %v279_v31 = vadd.f32 %v300_v26, %v278_v30  ;;  %v366_v32 = vpop.f32.mrb[3].mxu1 }
 0x1f9   :  { %283 = vst [vmem:[%s518_s5 + $0x8] sm:$0xff] %v279_v31 }
 0x1fa   :  { %288 = vsyncpa [#allocation3], 1 }
 0x1fb   :  { %289 = vsyncpa [#allocation5], 1 }

</bundles_post_ra>
